<compile_context>
chip_gen: v5e
topology: v5e:2x2
jax: 0.10.0
libtpu: 0.0.40
codegen_flags: <defaults>
</compile_context>

<pallas_src>
import math

import jax
import jax.numpy as jnp
from jax.experimental import pallas as pl
from jax.experimental.pallas import tpu as pltpu


def electra_cls_kernel(
    x_ref,      # (S, E)  bf16 embedded tokens for one batch element
    mask_ref,   # (1, S)  f32 attention mask (1 = keep, 0 = pad)
    wp_ref, bp_ref,        # project:             E  -> D (= 2E)
    wq_ref, bq_ref,        # WQ:                  D  -> D   (CLS row only)
    wkv_ref, bkv_ref,      # fused WK|WV:         D  -> 2D
    wo_ref, bo_ref,        # outputdense:         D  -> D
    g1_ref, be1_ref,       # norm (LayerNorm over D)
    wi_ref, bi_ref,        # intermediate:        D  -> 2D
    winv_ref, binv_ref,    # inverseintermediate: 2D -> D
    g2_ref, be2_ref,       # norm2
    wfc1_ref, bfc1_ref,    # fc1:                 D  -> D
    wfc2_ref, bfc2_ref,    # fc2 (lane-padded):   D  -> 128 (real logit in col 0)
    out_ref,               # (1, 128) f32
):
    f32 = jnp.float32
    bf16 = jnp.bfloat16
    D = wq_ref.shape[1]

    def linear(t, w_ref, b_ref):
        # bf16 operands into the MXU, f32 accumulate, f32 bias add.
        y = jnp.dot(t.astype(bf16), w_ref[...], preferred_element_type=f32)
        return y + b_ref[...]

    def layernorm(t, g_ref, b_ref, eps=1e-12):
        # statistics in f32; rsqrt routed to the EUP.
        mu = jnp.mean(t, axis=-1, keepdims=True)
        var = jnp.mean((t - mu) ** 2, axis=-1, keepdims=True)
        return (t - mu) * jax.lax.rsqrt(var + eps) * g_ref[...] + b_ref[...]

    x = x_ref[...]                                   # (S, E) bf16

    # --- full-sequence work: only what K/V need ---
    h = linear(x, wp_ref, bp_ref)                    # (S, D) f32
    kv = linear(h, wkv_ref, bkv_ref)                 # (S, 2D) f32, fused K|V
    k = kv[:, :D]                                    # (at prod shapes D % 128 == 0,
    v = kv[:, D:]                                    #  so this slice is tile-aligned)

    # --- everything below only for the [CLS] (query position 0) row ---
    q0 = linear(h[0:1, :], wq_ref, bq_ref)           # (1, D) f32

    # scores = q0 @ k^T / sqrt(D)   -> (1, S), contraction over D, no transpose.
    scores = jax.lax.dot_general(
        q0.astype(bf16), k.astype(bf16),
        dimension_numbers=(((1,), (1,)), ((), ())),
        preferred_element_type=f32) * (1.0 / math.sqrt(float(D)))

    # additive mask (threshold compare, not exact float equality).
    m = mask_ref[...]                                # (1, S) f32
    scores = scores + jnp.where(m > 0.5, 0.0, -1000000000.0)

    # softmax over keys; stats in f32; denominator via EUP reciprocal.
    smax = jnp.max(scores, axis=-1, keepdims=True)
    p = jnp.exp(scores - smax)
    probs = p * pl.reciprocal(jnp.sum(p, axis=-1, keepdims=True), approx=True)

    attn = jnp.dot(probs.astype(bf16), v.astype(bf16),
                   preferred_element_type=f32)       # (1, D)

    o = layernorm(linear(attn, wo_ref, bo_ref), g1_ref, be1_ref)        # (1, D)
    inter = linear(o, wi_ref, bi_ref)                                   # (1, 2D)
    inv = layernorm(linear(inter, winv_ref, binv_ref), g2_ref, be2_ref) # (1, D)

    s1 = linear(inv, wfc1_ref, bfc1_ref)                                # (1, D)
    logits = linear(s1, wfc2_ref, bfc2_ref)                             # (1, 128)
    # torch.sigmoid, computed in f32; padded columns are harmless (sliced away).
    out_ref[...] = (1.0 / (1.0 + jnp.exp(-logits))).astype(out_ref.dtype)


def electra_forward(emb_data, mask, params):
    """emb_data: (B, S, E) embedded tokens; mask: (B, S) (1 = attend, 0 = pad).

    Returns (B, 1) sigmoid scores, matching ElectraModel.forward.
    """
    B, S, E = emb_data.shape
    x = emb_data.astype(jnp.bfloat16)
    mask3 = mask.astype(jnp.float32).reshape(B, 1, S)

    def resident(a):
        # Weights: full-array block, same block every grid step -> stays in VMEM,
        # no re-DMA per batch element.
        nd = a.ndim
        return pl.BlockSpec(a.shape, lambda b, nd=nd: (0,) * nd)

    in_specs = [
        pl.BlockSpec((None, S, E), lambda b: (b, 0, 0)),   # per-batch activations
        pl.BlockSpec((None, 1, S), lambda b: (b, 0, 0)),   # per-batch mask
    ] + [resident(p) for p in params]

    out_specs = pl.BlockSpec((None, 1, 128), lambda b: (b, 0, 0))  # lane-dense slab

    out_padded = pl.pallas_call(
        electra_cls_kernel,
        out_shape=jax.ShapeDtypeStruct((B, 1, 128), jnp.float32),
        grid=(B,),
        in_specs=in_specs,
        out_specs=out_specs,
        compiler_params=pltpu.CompilerParams(
            # Batch axis is independent -> shard across the 2 TCs on v7x.
            dimension_semantics=("parallel",),
            # Tiny working set here; at production shapes re-derive per
            # generation (~100 MiB v5e/v6e, ~48-56 MiB v7x) once S/D tiling is in.
            vmem_limit_bytes=48 << 20,
        ),
    )(x, mask3, *params)

    return out_padded[:, 0, 0:1]   # (B, 1)


def make_linear(key, fan_in, fan_out):
    """PyTorch-style uniform init; weight stored as (in, out), bias as (1, out)."""
    k_w, k_b = jax.random.split(key)
    bound = 1.0 / math.sqrt(fan_in)
    w = jax.random.uniform(k_w, (fan_in, fan_out), jnp.float32, -bound, bound)
    b = jax.random.uniform(k_b, (1, fan_out), jnp.float32, -bound, bound)
    return w, b


if __name__ == "__main__":
    # Small, module-consistent shapes.
    V, E, B, S = 12, 16, 2, 8        # vocab, embed dim, batch, seq len
    D = 2 * E                        # double_input_dim
    LANE = 128
    key = jax.random.PRNGKey(0)
    keys = jax.random.split(key, 16)

    # Embedding table (padding row V-1 kept as-is, matching nn.Parameter assignment).
    emb_table = jax.random.normal(keys[0], (V, E), jnp.float32)

    wp, bp = make_linear(keys[1], E, D)          # project
    wq, bq = make_linear(keys[2], D, D)          # WQ
    wk, bk = make_linear(keys[3], D, D)          # WK
    wv, bv = make_linear(keys[4], D, D)          # WV
    wo, bo = make_linear(keys[5], D, D)          # outputdense
    g1, be1 = jnp.ones((1, D), jnp.float32), jnp.zeros((1, D), jnp.float32)   # norm
    wi, bi = make_linear(keys[6], D, 2 * D)      # intermediate
    winv, binv = make_linear(keys[7], 2 * D, D)  # inverseintermediate
    g2, be2 = jnp.ones((1, D), jnp.float32), jnp.zeros((1, D), jnp.float32)   # norm2
    wfc1, bfc1 = make_linear(keys[8], D, D)      # fc1
    wfc2, bfc2 = make_linear(keys[9], D, 1)      # fc2 -> single sigmoid logit

    # Fused K/V projection: one (D, 2D) matmul instead of two (D, D) matmuls.
    wkv = jnp.concatenate([wk, wv], axis=1)
    bkv = jnp.concatenate([bk, bv], axis=1)

    # fc2 padded to a lane-dense 128-wide slab (real weight/bias in column 0).
    wfc2_pad = jnp.zeros((D, LANE), jnp.float32).at[:, 0:1].set(wfc2)
    bfc2_pad = jnp.zeros((1, LANE), jnp.float32).at[:, 0:1].set(bfc2)

    bf = jnp.bfloat16
    params = (
        wp.astype(bf), bp,
        wq.astype(bf), bq,
        wkv.astype(bf), bkv,
        wo.astype(bf), bo,
        g1, be1,
        wi.astype(bf), bi,
        winv.astype(bf), binv,
        g2, be2,
        wfc1.astype(bf), bfc1,
        wfc2_pad.astype(bf), bfc2_pad,
    )

    # Token ids and attention mask (1 = attend, 0 = padding).
    ids = jax.random.randint(keys[10], (B, S), 0, V, dtype=jnp.int32)
    mask = jnp.ones((B, S), jnp.float32).at[1, -2:].set(0.0)

    # Embedding lookup (glue; gather stays in plain JAX).
    emb_data = jnp.take(emb_table, ids, axis=0)      # (B, S, E)

    out = electra_forward(emb_data, mask, params)
    out = jax.block_until_ready(out)

    # Pure-JAX f32 reference of the original (unfused, full-sequence) module.
    def ref_forward(emb, msk):
        def lin(t, w, b):
            return t @ w + b

        def ln(t, g, b, eps=1e-12):
            mu = t.mean(-1, keepdims=True)
            var = ((t - mu) ** 2).mean(-1, keepdims=True)
            return (t - mu) / jnp.sqrt(var + eps) * g + b

        h = lin(emb, wp, bp)
        q = lin(h, wq, bq)
        k_ = lin(h, wk, bk)
        v_ = lin(h, wv, bv)
        sc = jnp.einsum("bqd,bkd->bqk", q, k_) / math.sqrt(D)
        sc = jnp.where(msk[:, None, :] == 0.0, -1000000000.0, sc)
        pr = jax.nn.softmax(sc, axis=-1)
        a = jnp.einsum("bqk,bkd->bqd", pr, v_)
        o = ln(lin(a, wo, bo), g1, be1)
        iv = ln(lin(lin(o, wi, bi), winv, binv), g2, be2)
        s1 = lin(iv[:, 0, :], wfc1, bfc1)
        return jax.nn.sigmoid(lin(s1, wfc2, bfc2))

    ref = ref_forward(emb_data, mask)

    assert out.shape == (B, 1)
    assert bool(jnp.all(jnp.isfinite(out)))
    assert bool(jnp.all((out > 0.0) & (out < 1.0)))
    assert bool(jnp.allclose(out, ref, atol=5e-2, rtol=5e-2)), (out, ref)
    print("KERNEL_OK")
</pallas_src>

<mosaic_0001>
module attributes {stable_mosaic.version = 11 : i64} {
  func.func @electra_cls_kernel(%arg0: i32, %arg1: memref<1x8x16xbf16, #tpu.memory_space<vmem>>, %arg2: memref<1x1x8xf32, #tpu.memory_space<vmem>>, %arg3: memref<16x32xbf16, #tpu.memory_space<vmem>>, %arg4: memref<1x32xf32, #tpu.memory_space<vmem>>, %arg5: memref<32x32xbf16, #tpu.memory_space<vmem>>, %arg6: memref<1x32xf32, #tpu.memory_space<vmem>>, %arg7: memref<32x64xbf16, #tpu.memory_space<vmem>>, %arg8: memref<1x64xf32, #tpu.memory_space<vmem>>, %arg9: memref<32x32xbf16, #tpu.memory_space<vmem>>, %arg10: memref<1x32xf32, #tpu.memory_space<vmem>>, %arg11: memref<1x32xf32, #tpu.memory_space<vmem>>, %arg12: memref<1x32xf32, #tpu.memory_space<vmem>>, %arg13: memref<32x64xbf16, #tpu.memory_space<vmem>>, %arg14: memref<1x64xf32, #tpu.memory_space<vmem>>, %arg15: memref<64x32xbf16, #tpu.memory_space<vmem>>, %arg16: memref<1x32xf32, #tpu.memory_space<vmem>>, %arg17: memref<1x32xf32, #tpu.memory_space<vmem>>, %arg18: memref<1x32xf32, #tpu.memory_space<vmem>>, %arg19: memref<32x32xbf16, #tpu.memory_space<vmem>>, %arg20: memref<1x32xf32, #tpu.memory_space<vmem>>, %arg21: memref<32x128xbf16, #tpu.memory_space<vmem>>, %arg22: memref<1x128xf32, #tpu.memory_space<vmem>>, %arg23: memref<1x1x128xf32, #tpu.memory_space<vmem>>) attributes {dimension_semantics = [#tpu.dimension_semantics<parallel>], iteration_bounds = array<i64: 2>, scalar_prefetch = 0 : i64, scratch_operands = 0 : i64, tpu.core_type = #tpu.core_type<tc>, window_params = [{transform_indices = @transform_0, window_bounds = array<i64: 1, 8, 16>}, {transform_indices = @transform_1, window_bounds = array<i64: 1, 1, 8>}, {pipeline_mode = #tpu.pipeline_mode<synchronous>, transform_indices = @transform_2, window_bounds = array<i64: 16, 32>}, {pipeline_mode = #tpu.pipeline_mode<synchronous>, transform_indices = @transform_3, window_bounds = array<i64: 1, 32>}, {pipeline_mode = #tpu.pipeline_mode<synchronous>, transform_indices = @transform_4, window_bounds = array<i64: 32, 32>}, {pipeline_mode = #tpu.pipeline_mode<synchronous>, transform_indices = @transform_5, window_bounds = array<i64: 1, 32>}, {pipeline_mode = #tpu.pipeline_mode<synchronous>, transform_indices = @transform_6, window_bounds = array<i64: 32, 64>}, {pipeline_mode = #tpu.pipeline_mode<synchronous>, transform_indices = @transform_7, window_bounds = array<i64: 1, 64>}, {pipeline_mode = #tpu.pipeline_mode<synchronous>, transform_indices = @transform_8, window_bounds = array<i64: 32, 32>}, {pipeline_mode = #tpu.pipeline_mode<synchronous>, transform_indices = @transform_9, window_bounds = array<i64: 1, 32>}, {pipeline_mode = #tpu.pipeline_mode<synchronous>, transform_indices = @transform_10, window_bounds = array<i64: 1, 32>}, {pipeline_mode = #tpu.pipeline_mode<synchronous>, transform_indices = @transform_11, window_bounds = array<i64: 1, 32>}, {pipeline_mode = #tpu.pipeline_mode<synchronous>, transform_indices = @transform_12, window_bounds = array<i64: 32, 64>}, {pipeline_mode = #tpu.pipeline_mode<synchronous>, transform_indices = @transform_13, window_bounds = array<i64: 1, 64>}, {pipeline_mode = #tpu.pipeline_mode<synchronous>, transform_indices = @transform_14, window_bounds = array<i64: 64, 32>}, {pipeline_mode = #tpu.pipeline_mode<synchronous>, transform_indices = @transform_15, window_bounds = array<i64: 1, 32>}, {pipeline_mode = #tpu.pipeline_mode<synchronous>, transform_indices = @transform_16, window_bounds = array<i64: 1, 32>}, {pipeline_mode = #tpu.pipeline_mode<synchronous>, transform_indices = @transform_17, window_bounds = array<i64: 1, 32>}, {pipeline_mode = #tpu.pipeline_mode<synchronous>, transform_indices = @transform_18, window_bounds = array<i64: 32, 32>}, {pipeline_mode = #tpu.pipeline_mode<synchronous>, transform_indices = @transform_19, window_bounds = array<i64: 1, 32>}, {pipeline_mode = #tpu.pipeline_mode<synchronous>, transform_indices = @transform_20, window_bounds = array<i64: 32, 128>}, {pipeline_mode = #tpu.pipeline_mode<synchronous>, transform_indices = @transform_21, window_bounds = array<i64: 1, 128>}, {transform_indices = @transform_22, window_bounds = array<i64: 1, 1, 128>}]} {
    %c0 = arith.constant 0 : index
    %c0_0 = arith.constant 0 : index
    %c0_1 = arith.constant 0 : index
    %0 = vector.load %arg1[%c0, %c0_0, %c0_1] : memref<1x8x16xbf16, #tpu.memory_space<vmem>>, vector<1x8x16xbf16>
    %1 = vector.shape_cast %0 : vector<1x8x16xbf16> to vector<8x16xbf16>
    %c0_2 = arith.constant 0 : index
    %c0_3 = arith.constant 0 : index
    %2 = vector.load %arg3[%c0_2, %c0_3] : memref<16x32xbf16, #tpu.memory_space<vmem>>, vector<16x32xbf16>
    %cst = arith.constant dense<0.000000e+00> : vector<8x32xf32>
    %3 = tpu.matmul %1, %2, %cst {dimension_numbers = #tpu.dot_dimension_numbers<[1], [0], [0], [1], [0, 0, 1, 1], [], []>} : vector<8x16xbf16>, vector<16x32xbf16>, vector<8x32xf32> -> vector<8x32xf32>
    %c0_4 = arith.constant 0 : index
    %c0_5 = arith.constant 0 : index
    %4 = vector.load %arg4[%c0_4, %c0_5] : memref<1x32xf32, #tpu.memory_space<vmem>>, vector<1x32xf32>
    %5 = vector.broadcast %4 : vector<1x32xf32> to vector<8x32xf32>
    %6 = arith.addf %3, %5 : vector<8x32xf32>
    %7 = arith.truncf %6 : vector<8x32xf32> to vector<8x32xbf16>
    %c0_6 = arith.constant 0 : index
    %c0_7 = arith.constant 0 : index
    %8 = vector.load %arg7[%c0_6, %c0_7] : memref<32x64xbf16, #tpu.memory_space<vmem>>, vector<32x64xbf16>
    %cst_8 = arith.constant dense<0.000000e+00> : vector<8x64xf32>
    %9 = tpu.matmul %7, %8, %cst_8 {dimension_numbers = #tpu.dot_dimension_numbers<[1], [0], [0], [1], [0, 0, 1, 1], [], []>} : vector<8x32xbf16>, vector<32x64xbf16>, vector<8x64xf32> -> vector<8x64xf32>
    %c0_9 = arith.constant 0 : index
    %c0_10 = arith.constant 0 : index
    %10 = vector.load %arg8[%c0_9, %c0_10] : memref<1x64xf32, #tpu.memory_space<vmem>>, vector<1x64xf32>
    %11 = vector.broadcast %10 : vector<1x64xf32> to vector<8x64xf32>
    %12 = arith.addf %9, %11 : vector<8x64xf32>
    %13 = vector.extract_strided_slice %12 {offsets = [0, 0], sizes = [8, 32], strides = [1, 1]} : vector<8x64xf32> to vector<8x32xf32>
    %14 = vector.extract_strided_slice %12 {offsets = [0, 32], sizes = [8, 32], strides = [1, 1]} : vector<8x64xf32> to vector<8x32xf32>
    %15 = vector.extract_strided_slice %6 {offsets = [0, 0], sizes = [1, 32], strides = [1, 1]} : vector<8x32xf32> to vector<1x32xf32>
    %16 = arith.truncf %15 : vector<1x32xf32> to vector<1x32xbf16>
    %c0_11 = arith.constant 0 : index
    %c0_12 = arith.constant 0 : index
    %17 = vector.load %arg5[%c0_11, %c0_12] : memref<32x32xbf16, #tpu.memory_space<vmem>>, vector<32x32xbf16>
    %cst_13 = arith.constant dense<0.000000e+00> : vector<1x32xf32>
    %18 = tpu.matmul %16, %17, %cst_13 {dimension_numbers = #tpu.dot_dimension_numbers<[1], [0], [0], [1], [0, 0, 1, 1], [], []>} : vector<1x32xbf16>, vector<32x32xbf16>, vector<1x32xf32> -> vector<1x32xf32>
    %c0_14 = arith.constant 0 : index
    %c0_15 = arith.constant 0 : index
    %19 = vector.load %arg6[%c0_14, %c0_15] : memref<1x32xf32, #tpu.memory_space<vmem>>, vector<1x32xf32>
    %20 = arith.addf %18, %19 : vector<1x32xf32>
    %21 = arith.truncf %20 : vector<1x32xf32> to vector<1x32xbf16>
    %22 = arith.truncf %13 : vector<8x32xf32> to vector<8x32xbf16>
    %cst_16 = arith.constant dense<0.000000e+00> : vector<1x8xf32>
    %23 = tpu.matmul %21, %22, %cst_16 {dimension_numbers = #tpu.dot_dimension_numbers<[1], [1], [0], [0], [0, 0, 1, 0], [], []>} : vector<1x32xbf16>, vector<8x32xbf16>, vector<1x8xf32> -> vector<1x8xf32>
    %cst_17 = arith.constant 0.176776692 : f32
    %24 = vector.broadcast %cst_17 : f32 to vector<1x8xf32>
    %25 = arith.mulf %23, %24 : vector<1x8xf32>
    %c0_18 = arith.constant 0 : index
    %c0_19 = arith.constant 0 : index
    %c0_20 = arith.constant 0 : index
    %26 = vector.load %arg2[%c0_18, %c0_19, %c0_20] : memref<1x1x8xf32, #tpu.memory_space<vmem>>, vector<1x1x8xf32>
    %27 = vector.shape_cast %26 : vector<1x1x8xf32> to vector<1x8xf32>
    %cst_21 = arith.constant 5.000000e-01 : f32
    %28 = vector.broadcast %cst_21 : f32 to vector<1x8xf32>
    %29 = arith.cmpf ogt, %27, %28 : vector<1x8xf32>
    %cst_22 = arith.constant 0.000000e+00 : f32
    %cst_23 = arith.constant -1.000000e+09 : f32
    %30 = vector.broadcast %cst_22 : f32 to vector<1x8xf32>
    %31 = vector.broadcast %cst_23 : f32 to vector<1x8xf32>
    %32 = arith.select %29, %30, %31 : vector<1x8xi1>, vector<1x8xf32>
    %33 = arith.addf %25, %32 : vector<1x8xf32>
    %cst_24 = arith.constant dense<0xFF800000> : vector<1xf32>
    %34 = vector.multi_reduction <maximumf>, %33, %cst_24 [1] : vector<1x8xf32> to vector<1xf32>
    %35 = vector.shape_cast %34 : vector<1xf32> to vector<1x1xf32>
    %36 = vector.broadcast %35 : vector<1x1xf32> to vector<1x8xf32>
    %37 = arith.subf %33, %36 : vector<1x8xf32>
    %38 = math.exp %37 : vector<1x8xf32>
    %cst_25 = arith.constant dense<0.000000e+00> : vector<1xf32>
    %39 = vector.multi_reduction <add>, %38, %cst_25 [1] : vector<1x8xf32> to vector<1xf32>
    %40 = vector.shape_cast %39 : vector<1xf32> to vector<1x1xf32>
    %41 = tpu.reciprocal %40 {approx = true} : vector<1x1xf32> -> vector<1x1xf32>
    %42 = vector.broadcast %41 : vector<1x1xf32> to vector<1x8xf32>
    %43 = arith.mulf %38, %42 : vector<1x8xf32>
    %44 = arith.truncf %43 : vector<1x8xf32> to vector<1x8xbf16>
    %45 = arith.truncf %14 : vector<8x32xf32> to vector<8x32xbf16>
    %cst_26 = arith.constant dense<0.000000e+00> : vector<1x32xf32>
    %46 = tpu.matmul %44, %45, %cst_26 {dimension_numbers = #tpu.dot_dimension_numbers<[1], [0], [0], [1], [0, 0, 1, 1], [], []>} : vector<1x8xbf16>, vector<8x32xbf16>, vector<1x32xf32> -> vector<1x32xf32>
    %47 = arith.truncf %46 : vector<1x32xf32> to vector<1x32xbf16>
    %c0_27 = arith.constant 0 : index
    %c0_28 = arith.constant 0 : index
    %48 = vector.load %arg9[%c0_27, %c0_28] : memref<32x32xbf16, #tpu.memory_space<vmem>>, vector<32x32xbf16>
    %cst_29 = arith.constant dense<0.000000e+00> : vector<1x32xf32>
    %49 = tpu.matmul %47, %48, %cst_29 {dimension_numbers = #tpu.dot_dimension_numbers<[1], [0], [0], [1], [0, 0, 1, 1], [], []>} : vector<1x32xbf16>, vector<32x32xbf16>, vector<1x32xf32> -> vector<1x32xf32>
    %c0_30 = arith.constant 0 : index
    %c0_31 = arith.constant 0 : index
    %50 = vector.load %arg10[%c0_30, %c0_31] : memref<1x32xf32, #tpu.memory_space<vmem>>, vector<1x32xf32>
    %51 = arith.addf %49, %50 : vector<1x32xf32>
    %cst_32 = arith.constant dense<0.000000e+00> : vector<1xf32>
    %52 = vector.multi_reduction <add>, %51, %cst_32 [1] : vector<1x32xf32> to vector<1xf32>
    %53 = vector.shape_cast %52 : vector<1xf32> to vector<1x1xf32>
    %cst_33 = arith.constant 3.200000e+01 : f32
    %54 = vector.broadcast %cst_33 : f32 to vector<1x1xf32>
    %55 = arith.divf %53, %54 : vector<1x1xf32>
    %56 = vector.broadcast %55 : vector<1x1xf32> to vector<1x32xf32>
    %57 = arith.subf %51, %56 : vector<1x32xf32>
    %58 = arith.mulf %57, %57 : vector<1x32xf32>
    %cst_34 = arith.constant dense<0.000000e+00> : vector<1xf32>
    %59 = vector.multi_reduction <add>, %58, %cst_34 [1] : vector<1x32xf32> to vector<1xf32>
    %60 = vector.shape_cast %59 : vector<1xf32> to vector<1x1xf32>
    %cst_35 = arith.constant 3.200000e+01 : f32
    %61 = vector.broadcast %cst_35 : f32 to vector<1x1xf32>
    %62 = arith.divf %60, %61 : vector<1x1xf32>
    %63 = vector.broadcast %55 : vector<1x1xf32> to vector<1x32xf32>
    %64 = arith.subf %51, %63 : vector<1x32xf32>
    %cst_36 = arith.constant 9.99999996E-13 : f32
    %65 = vector.broadcast %cst_36 : f32 to vector<1x1xf32>
    %66 = arith.addf %62, %65 : vector<1x1xf32>
    %67 = math.rsqrt %66 : vector<1x1xf32>
    %68 = vector.broadcast %67 : vector<1x1xf32> to vector<1x32xf32>
    %69 = arith.mulf %64, %68 : vector<1x32xf32>
    %c0_37 = arith.constant 0 : index
    %c0_38 = arith.constant 0 : index
    %70 = vector.load %arg11[%c0_37, %c0_38] : memref<1x32xf32, #tpu.memory_space<vmem>>, vector<1x32xf32>
    %71 = arith.mulf %69, %70 : vector<1x32xf32>
    %c0_39 = arith.constant 0 : index
    %c0_40 = arith.constant 0 : index
    %72 = vector.load %arg12[%c0_39, %c0_40] : memref<1x32xf32, #tpu.memory_space<vmem>>, vector<1x32xf32>
    %73 = arith.addf %71, %72 : vector<1x32xf32>
    %74 = arith.truncf %73 : vector<1x32xf32> to vector<1x32xbf16>
    %c0_41 = arith.constant 0 : index
    %c0_42 = arith.constant 0 : index
    %75 = vector.load %arg13[%c0_41, %c0_42] : memref<32x64xbf16, #tpu.memory_space<vmem>>, vector<32x64xbf16>
    %cst_43 = arith.constant dense<0.000000e+00> : vector<1x64xf32>
    %76 = tpu.matmul %74, %75, %cst_43 {dimension_numbers = #tpu.dot_dimension_numbers<[1], [0], [0], [1], [0, 0, 1, 1], [], []>} : vector<1x32xbf16>, vector<32x64xbf16>, vector<1x64xf32> -> vector<1x64xf32>
    %c0_44 = arith.constant 0 : index
    %c0_45 = arith.constant 0 : index
    %77 = vector.load %arg14[%c0_44, %c0_45] : memref<1x64xf32, #tpu.memory_space<vmem>>, vector<1x64xf32>
    %78 = arith.addf %76, %77 : vector<1x64xf32>
    %79 = arith.truncf %78 : vector<1x64xf32> to vector<1x64xbf16>
    %c0_46 = arith.constant 0 : index
    %c0_47 = arith.constant 0 : index
    %80 = vector.load %arg15[%c0_46, %c0_47] : memref<64x32xbf16, #tpu.memory_space<vmem>>, vector<64x32xbf16>
    %cst_48 = arith.constant dense<0.000000e+00> : vector<1x32xf32>
    %81 = tpu.matmul %79, %80, %cst_48 {dimension_numbers = #tpu.dot_dimension_numbers<[1], [0], [0], [1], [0, 0, 1, 1], [], []>} : vector<1x64xbf16>, vector<64x32xbf16>, vector<1x32xf32> -> vector<1x32xf32>
    %c0_49 = arith.constant 0 : index
    %c0_50 = arith.constant 0 : index
    %82 = vector.load %arg16[%c0_49, %c0_50] : memref<1x32xf32, #tpu.memory_space<vmem>>, vector<1x32xf32>
    %83 = arith.addf %81, %82 : vector<1x32xf32>
    %cst_51 = arith.constant dense<0.000000e+00> : vector<1xf32>
    %84 = vector.multi_reduction <add>, %83, %cst_51 [1] : vector<1x32xf32> to vector<1xf32>
    %85 = vector.shape_cast %84 : vector<1xf32> to vector<1x1xf32>
    %cst_52 = arith.constant 3.200000e+01 : f32
    %86 = vector.broadcast %cst_52 : f32 to vector<1x1xf32>
    %87 = arith.divf %85, %86 : vector<1x1xf32>
    %88 = vector.broadcast %87 : vector<1x1xf32> to vector<1x32xf32>
    %89 = arith.subf %83, %88 : vector<1x32xf32>
    %90 = arith.mulf %89, %89 : vector<1x32xf32>
    %cst_53 = arith.constant dense<0.000000e+00> : vector<1xf32>
    %91 = vector.multi_reduction <add>, %90, %cst_53 [1] : vector<1x32xf32> to vector<1xf32>
    %92 = vector.shape_cast %91 : vector<1xf32> to vector<1x1xf32>
    %cst_54 = arith.constant 3.200000e+01 : f32
    %93 = vector.broadcast %cst_54 : f32 to vector<1x1xf32>
    %94 = arith.divf %92, %93 : vector<1x1xf32>
    %95 = vector.broadcast %87 : vector<1x1xf32> to vector<1x32xf32>
    %96 = arith.subf %83, %95 : vector<1x32xf32>
    %cst_55 = arith.constant 9.99999996E-13 : f32
    %97 = vector.broadcast %cst_55 : f32 to vector<1x1xf32>
    %98 = arith.addf %94, %97 : vector<1x1xf32>
    %99 = math.rsqrt %98 : vector<1x1xf32>
    %100 = vector.broadcast %99 : vector<1x1xf32> to vector<1x32xf32>
    %101 = arith.mulf %96, %100 : vector<1x32xf32>
    %c0_56 = arith.constant 0 : index
    %c0_57 = arith.constant 0 : index
    %102 = vector.load %arg17[%c0_56, %c0_57] : memref<1x32xf32, #tpu.memory_space<vmem>>, vector<1x32xf32>
    %103 = arith.mulf %101, %102 : vector<1x32xf32>
    %c0_58 = arith.constant 0 : index
    %c0_59 = arith.constant 0 : index
    %104 = vector.load %arg18[%c0_58, %c0_59] : memref<1x32xf32, #tpu.memory_space<vmem>>, vector<1x32xf32>
    %105 = arith.addf %103, %104 : vector<1x32xf32>
    %106 = arith.truncf %105 : vector<1x32xf32> to vector<1x32xbf16>
    %c0_60 = arith.constant 0 : index
    %c0_61 = arith.constant 0 : index
    %107 = vector.load %arg19[%c0_60, %c0_61] : memref<32x32xbf16, #tpu.memory_space<vmem>>, vector<32x32xbf16>
    %cst_62 = arith.constant dense<0.000000e+00> : vector<1x32xf32>
    %108 = tpu.matmul %106, %107, %cst_62 {dimension_numbers = #tpu.dot_dimension_numbers<[1], [0], [0], [1], [0, 0, 1, 1], [], []>} : vector<1x32xbf16>, vector<32x32xbf16>, vector<1x32xf32> -> vector<1x32xf32>
    %c0_63 = arith.constant 0 : index
    %c0_64 = arith.constant 0 : index
    %109 = vector.load %arg20[%c0_63, %c0_64] : memref<1x32xf32, #tpu.memory_space<vmem>>, vector<1x32xf32>
    %110 = arith.addf %108, %109 : vector<1x32xf32>
    %111 = arith.truncf %110 : vector<1x32xf32> to vector<1x32xbf16>
    %c0_65 = arith.constant 0 : index
    %c0_66 = arith.constant 0 : index
    %112 = vector.load %arg21[%c0_65, %c0_66] : memref<32x128xbf16, #tpu.memory_space<vmem>>, vector<32x128xbf16>
    %cst_67 = arith.constant dense<0.000000e+00> : vector<1x128xf32>
    %113 = tpu.matmul %111, %112, %cst_67 {dimension_numbers = #tpu.dot_dimension_numbers<[1], [0], [0], [1], [0, 0, 1, 1], [], []>} : vector<1x32xbf16>, vector<32x128xbf16>, vector<1x128xf32> -> vector<1x128xf32>
    %c0_68 = arith.constant 0 : index
    %c0_69 = arith.constant 0 : index
    %114 = vector.load %arg22[%c0_68, %c0_69] : memref<1x128xf32, #tpu.memory_space<vmem>>, vector<1x128xf32>
    %115 = arith.addf %113, %114 : vector<1x128xf32>
    %cst_70 = arith.constant 0.000000e+00 : f32
    %116 = vector.broadcast %cst_70 : f32 to vector<1x128xf32>
    %117 = arith.subf %116, %115 : vector<1x128xf32>
    %118 = math.exp %117 : vector<1x128xf32>
    %cst_71 = arith.constant 1.000000e+00 : f32
    %119 = vector.broadcast %cst_71 : f32 to vector<1x128xf32>
    %120 = arith.addf %119, %118 : vector<1x128xf32>
    %cst_72 = arith.constant 1.000000e+00 : f32
    %121 = vector.broadcast %cst_72 : f32 to vector<1x128xf32>
    %122 = arith.divf %121, %120 : vector<1x128xf32>
    %c0_73 = arith.constant 0 : index
    %c0_74 = arith.constant 0 : index
    %c0_75 = arith.constant 0 : index
    %123 = vector.load %arg23[%c0_73, %c0_74, %c0_75] : memref<1x1x128xf32, #tpu.memory_space<vmem>>, vector<1x1x128xf32>
    %124 = vector.shape_cast %123 : vector<1x1x128xf32> to vector<1x128xf32>
    %125 = vector.shape_cast %122 : vector<1x128xf32> to vector<1x1x128xf32>
    tpu.vector_store %arg23[%c0_73, %c0_74, %c0_75], %125 {strides = array<i32>} : memref<1x1x128xf32, #tpu.memory_space<vmem>>, vector<1x1x128xf32>,
    return
  }
  func.func @transform_0(%arg0: i32) -> (i32, i32, i32) {
    %c0_i32 = arith.constant 0 : i32
    %c0_i32_0 = arith.constant 0 : i32
    %c0_i32_1 = arith.constant 0 : i32
    return %arg0, %c0_i32, %c0_i32_0 : i32, i32, i32
  }
  func.func @transform_1(%arg0: i32) -> (i32, i32, i32) {
    %c0_i32 = arith.constant 0 : i32
    %c0_i32_0 = arith.constant 0 : i32
    %c0_i32_1 = arith.constant 0 : i32
    return %arg0, %c0_i32, %c0_i32_0 : i32, i32, i32
  }
  func.func @transform_2(%arg0: i32) -> (i32, i32) {
    %c0_i32 = arith.constant 0 : i32
    %c0_i32_0 = arith.constant 0 : i32
    %c0_i32_1 = arith.constant 0 : i32
    return %c0_i32, %c0_i32_0 : i32, i32
  }
  func.func @transform_3(%arg0: i32) -> (i32, i32) {
    %c0_i32 = arith.constant 0 : i32
    %c0_i32_0 = arith.constant 0 : i32
    %c0_i32_1 = arith.constant 0 : i32
    return %c0_i32, %c0_i32_0 : i32, i32
  }
  func.func @transform_4(%arg0: i32) -> (i32, i32) {
    %c0_i32 = arith.constant 0 : i32
    %c0_i32_0 = arith.constant 0 : i32
    %c0_i32_1 = arith.constant 0 : i32
    return %c0_i32, %c0_i32_0 : i32, i32
  }
  func.func @transform_5(%arg0: i32) -> (i32, i32) {
    %c0_i32 = arith.constant 0 : i32
    %c0_i32_0 = arith.constant 0 : i32
    %c0_i32_1 = arith.constant 0 : i32
    return %c0_i32, %c0_i32_0 : i32, i32
  }
  func.func @transform_6(%arg0: i32) -> (i32, i32) {
    %c0_i32 = arith.constant 0 : i32
    %c0_i32_0 = arith.constant 0 : i32
    %c0_i32_1 = arith.constant 0 : i32
    return %c0_i32, %c0_i32_0 : i32, i32
  }
  func.func @transform_7(%arg0: i32) -> (i32, i32) {
    %c0_i32 = arith.constant 0 : i32
    %c0_i32_0 = arith.constant 0 : i32
    %c0_i32_1 = arith.constant 0 : i32
    return %c0_i32, %c0_i32_0 : i32, i32
  }
  func.func @transform_8(%arg0: i32) -> (i32, i32) {
    %c0_i32 = arith.constant 0 : i32
    %c0_i32_0 = arith.constant 0 : i32
    %c0_i32_1 = arith.constant 0 : i32
    return %c0_i32, %c0_i32_0 : i32, i32
  }
  func.func @transform_9(%arg0: i32) -> (i32, i32) {
    %c0_i32 = arith.constant 0 : i32
    %c0_i32_0 = arith.constant 0 : i32
    %c0_i32_1 = arith.constant 0 : i32
    return %c0_i32, %c0_i32_0 : i32, i32
  }
  func.func @transform_10(%arg0: i32) -> (i32, i32) {
    %c0_i32 = arith.constant 0 : i32
    %c0_i32_0 = arith.constant 0 : i32
    %c0_i32_1 = arith.constant 0 : i32
    return %c0_i32, %c0_i32_0 : i32, i32
  }
  func.func @transform_11(%arg0: i32) -> (i32, i32) {
    %c0_i32 = arith.constant 0 : i32
    %c0_i32_0 = arith.constant 0 : i32
    %c0_i32_1 = arith.constant 0 : i32
    return %c0_i32, %c0_i32_0 : i32, i32
  }
  func.func @transform_12(%arg0: i32) -> (i32, i32) {
    %c0_i32 = arith.constant 0 : i32
    %c0_i32_0 = arith.constant 0 : i32
    %c0_i32_1 = arith.constant 0 : i32
    return %c0_i32, %c0_i32_0 : i32, i32
  }
  func.func @transform_13(%arg0: i32) -> (i32, i32) {
    %c0_i32 = arith.constant 0 : i32
    %c0_i32_0 = arith.constant 0 : i32
    %c0_i32_1 = arith.constant 0 : i32
    return %c0_i32, %c0_i32_0 : i32, i32
  }
  func.func @transform_14(%arg0: i32) -> (i32, i32) {
    %c0_i32 = arith.constant 0 : i32
    %c0_i32_0 = arith.constant 0 : i32
    %c0_i32_1 = arith.constant 0 : i32
    return %c0_i32, %c0_i32_0 : i32, i32
  }
  func.func @transform_15(%arg0: i32) -> (i32, i32) {
    %c0_i32 = arith.constant 0 : i32
    %c0_i32_0 = arith.constant 0 : i32
    %c0_i32_1 = arith.constant 0 : i32
    return %c0_i32, %c0_i32_0 : i32, i32
  }
  func.func @transform_16(%arg0: i32) -> (i32, i32) {
    %c0_i32 = arith.constant 0 : i32
    %c0_i32_0 = arith.constant 0 : i32
    %c0_i32_1 = arith.constant 0 : i32
    return %c0_i32, %c0_i32_0 : i32, i32
  }
  func.func @transform_17(%arg0: i32) -> (i32, i32) {
    %c0_i32 = arith.constant 0 : i32
    %c0_i32_0 = arith.constant 0 : i32
    %c0_i32_1 = arith.constant 0 : i32
    return %c0_i32, %c0_i32_0 : i32, i32
  }
  func.func @transform_18(%arg0: i32) -> (i32, i32) {
    %c0_i32 = arith.constant 0 : i32
    %c0_i32_0 = arith.constant 0 : i32
    %c0_i32_1 = arith.constant 0 : i32
    return %c0_i32, %c0_i32_0 : i32, i32
  }
  func.func @transform_19(%arg0: i32) -> (i32, i32) {
    %c0_i32 = arith.constant 0 : i32
    %c0_i32_0 = arith.constant 0 : i32
    %c0_i32_1 = arith.constant 0 : i32
    return %c0_i32, %c0_i32_0 : i32, i32
  }
  func.func @transform_20(%arg0: i32) -> (i32, i32) {
    %c0_i32 = arith.constant 0 : i32
    %c0_i32_0 = arith.constant 0 : i32
    %c0_i32_1 = arith.constant 0 : i32
    return %c0_i32, %c0_i32_0 : i32, i32
  }
  func.func @transform_21(%arg0: i32) -> (i32, i32) {
    %c0_i32 = arith.constant 0 : i32
    %c0_i32_0 = arith.constant 0 : i32
    %c0_i32_1 = arith.constant 0 : i32
    return %c0_i32, %c0_i32_0 : i32, i32
  }
  func.func @transform_22(%arg0: i32) -> (i32, i32, i32) {
    %c0_i32 = arith.constant 0 : i32
    %c0_i32_0 = arith.constant 0 : i32
    %c0_i32_1 = arith.constant 0 : i32
    return %arg0, %c0_i32, %c0_i32_0 : i32, i32, i32
  }
}

</mosaic_0001>

<bundles_post_ra>
// kernel: tpu_custom_call.1
= control target key start
LH: loop header
LB: loop body
LE: loop exit
PB: predicated region body
PF: predicated region fallthrough
CT: control target
= control target key end

     0   :  { %s2929_s0 = inlined_call_operand.hbm [shape: bf16[2,8,16], index: 0, kind: input, shape index: {}]   ;;  %s2930_s1 = inlined_call_operand.hbm [shape: f32[2,1,8], index: 1, kind: input, shape index: {}]   ;;  %s2931_s2 = inlined_call_operand.hbm [shape: bf16[16,32], index: 2, kind: input, shape index: {}]   ;;  %s2932_s3 = inlined_call_operand.hbm [shape: f32[1,32], index: 3, kind: input, shape index: {}]   ;;  %s2933_s4 = inlined_call_operand.vmem [shape: bf16[32,32], index: 4, kind: input, shape index: {}]   ;;  %s2934_s5 = inlined_call_operand.hbm [shape: f32[1,32], index: 5, kind: input, shape index: {}]   ;;  %s2935_s6 = inlined_call_operand.vmem [shape: bf16[32,64], index: 6, kind: input, shape index: {}]   ;;  %s2936_s7 = inlined_call_operand.hbm [shape: f32[1,64], index: 7, kind: input, shape index: {}]   ;;  %s2937_s8 = inlined_call_operand.vmem [shape: bf16[32,32], index: 8, kind: input, shape index: {}]   ;;  %s2938_s9 = inlined_call_operand.hbm [shape: f32[1,32], index: 9, kind: input, shape index: {}]   ;;  %s2939_s10 = inlined_call_operand.hbm [shape: f32[1,32], index: 10, kind: input, shape index: {}]   ;;  %s2940_s11 = inlined_call_operand.hbm [shape: f32[1,32], index: 11, kind: input, shape index: {}]   ;;  %s2941_s12 = inlined_call_operand.hbm [shape: bf16[32,64], index: 12, kind: input, shape index: {}]   ;;  %s2942_s13 = inlined_call_operand.hbm [shape: f32[1,64], index: 13, kind: input, shape index: {}]   ;;  %s2943_s14 = inlined_call_operand.vmem [shape: bf16[64,32], index: 14, kind: input, shape index: {}]   ;;  %s2944_s15 = inlined_call_operand.hbm [shape: f32[1,32], index: 15, kind: input, shape index: {}]   ;;  %s2945_s16 = inlined_call_operand.hbm [shape: f32[1,32], index: 16, kind: input, shape index: {}]   ;;  %s2946_s17 = inlined_call_operand.hbm [shape: f32[1,32], index: 17, kind: input, shape index: {}]   ;;  %s2947_s18 = inlined_call_operand.vmem [shape: bf16[32,32], index: 18, kind: input, shape index: {}]   ;;  %s2948_s19 = inlined_call_operand.vmem [shape: f32[1,32], index: 19, kind: input, shape index: {}]   ;;  %s2949_s20 = inlined_call_operand.hbm [shape: bf16[32,128], index: 20, kind: input, shape index: {}]   ;;  %s2950_s21 = inlined_call_operand.vmem [shape: f32[1,128], index: 21, kind: input, shape index: {}]   ;;  %s2951_s22 = inlined_call_operand.hbm [shape: f32[2,1,128], index: 22, kind: output, shape index: {}]  }
   0x1   :  { %2961 = sst [smem:[#allocation38_spill]] %s2929_s0 }
   0x2   :  { %2962 = sst [smem:[#allocation39_spill]] %s2930_s1 }
   0x3   :  { %2963 = sst [smem:[#allocation40_spill]] %s2931_s2 }
   0x4   :  { %2964 = sst [smem:[#allocation41_spill]] %s2932_s3 }
   0x5   :  { %2965 = sst [smem:[#allocation42_spill]] %s2933_s4 }
   0x6   :  { %2966 = sst [smem:[#allocation43_spill]] %s2934_s5 }
   0x7   :  { %2967 = sst [smem:[#allocation44_spill]] %s2935_s6 }
   0x8   :  { %2968 = sst [smem:[#allocation45_spill]] %s2936_s7 }
   0x9   :  { %2969 = sst [smem:[#allocation46_spill]] %s2937_s8 }
   0xa   :  { %2970 = sst [smem:[#allocation47_spill]] %s2938_s9 }
   0xb   :  { %2971 = sst [smem:[#allocation48_spill]] %s2939_s10 }
   0xc   :  { %2972 = sst [smem:[#allocation49_spill]] %s2940_s11 }
   0xd   :  { %2973 = sst [smem:[#allocation50_spill]] %s2941_s12 }
   0xe   :  { %2974 = sst [smem:[#allocation51_spill]] %s2942_s13 }
   0xf   :  { %2975 = sst [smem:[#allocation52_spill]] %s2943_s14 }
  0x10   :  { %2976 = sst [smem:[#allocation53_spill]] %s2944_s15 }
  0x11   :  { %2977 = sst [smem:[#allocation54_spill]] %s2945_s16 }
  0x12   :  { %2978 = sst [smem:[#allocation55_spill]] %s2946_s17 }
  0x13   :  { %2979 = sst [smem:[#allocation56_spill]] %s2947_s18 }
  0x14   :  { %2980 = sst [smem:[#allocation57_spill]] %s2948_s19 }
  0x15   :  { %2981 = sst [smem:[#allocation58_spill]] %s2950_s21 }
  0x16   :  { %2982 = sst [smem:[#allocation59_spill]] %s2951_s22 }
  0x17   :  { %27 = vsyncpa [#allocation3], 0 }
  0x18   :  { %29 = vsyncpa [#allocation3 + $0x1], 0 }
  0x19   :  { %30 = vsyncpa [#allocation6], 0 }
  0x1a   :  { %32 = vsyncpa [#allocation6 + $0x1], 0 }
  0x1b   :  { %33 = vsyncpa [#allocation9], 0 }
  0x1c   :  { %34 = vsyncpa [#allocation12], 0 }
  0x1d   :  { %35 = vsyncpa [#allocation15], 0 }
  0x1e   :  { %36 = vsyncpa [#allocation18], 0 }
  0x1f   :  { %37 = vsyncpa [#allocation21], 0 }
  0x20   :  { %38 = vsyncpa [#allocation24], 0 }
  0x21   :  { %39 = vsyncpa [#allocation4], 0 }
  0x22   :  { %41 = vsyncpa [#allocation4 + $0x1], 0  ;;  %s2595_s3 = smov 0   ;;  %s2597_s28 = smov 0  }
  0x23   :  { %s2599_s29 = smov 0   ;;  %s2601_s30 = smov 0  }
  0x24 LB: > { %s2983_s23 = sld [smem:[#allocation40_spill]]  ;;  %s2619_s5 = sadd.s32 4294967295, %s2460_s30   ;;  %s2460_s30 = sphi %s2601_s30, %s3018_s30   ;;  %s2456_s29 = sphi %s2599_s29, %s3017_s29   ;;  %s2452_s28 = sphi %s2597_s28, %s3016_s28   ;;  %s2448_s3 = sphi %s2595_s3, %s3015_s3  }
  0x25   : > { %p1580_p0 = scmp.ge.s32.totalorder %s2460_s30, 1  ;;  %p68_p1 = scmp.eq.s32.totalorder %s2619_s5, 0 }
  0x26   : > { %p550_p2 = scmp.lt.s32.totalorder %s2460_s30, 3  ;;  %s2462_s6 = smov [#allocation7]  }
  0x27   : > { %s563_s25 = sshll.u32 %s2462_s6, 4  ;;  %s2986_s27 = sld [smem:[#allocation41_spill]]  ;;  %s564_s25 = int_to_ptr.vmem [resolvable:$true] %s563_s25 }
  0x28   : > { %p2624_p3 = pnand %p1580_p0, %p550_p2  ;;  %s2988_s7 = sld [smem:[#allocation45_spill]] }
  0x29   : > { %s2463_s21 = smov [#allocation8]   ;;  %s2464_s18 = smov 64  }
  0x2a   : > { %s561_s1 = sshll.u32 %s2983_s23, 4  ;;  %p1767_p4 = pneg %p2624_p3  ;;  %s562_s1 = int_to_ptr.hbm [resolvable:$true] %s561_s1 }
  0x2b   : > { %s2984_s24 = scalar_select %p2624_p3, 1, 0 }
  0x2c   : > { %p2636_p6 = pnand %p1767_p4, %p68_p1  ;;  %s578_s19 = sshll.u32 %s2463_s21, 4  ;;  %s579_s19 = int_to_ptr.vmem [resolvable:$true] %s578_s19 }
  0x2d   : > { %2985 = sst [smem:[#allocation37_spill]] %s2984_s24  ;;  %s576_s4 = sshll.u32 %s2986_s27, 4  ;;  %s577_s4 = int_to_ptr.hbm [resolvable:$true] %s576_s4 }
  0x2e   : > { %s606_s6 = sshll.u32 %s2988_s7, 4  ;;  %s2465_s14 = smov 4   ;;  %s607_s6 = int_to_ptr.hbm [resolvable:$true] %s606_s6 }
  0x2f   : > { %1770 = dma.hbm_to_vmem [thread:$0]  (!%p2636_p6), %s562_s1, 128, %s564_s25, [#allocation6], %s2464_s18, %s2464_s18, %s2465_s14  }
  0x30   : > { %1773 = dma.hbm_to_vmem [thread:$0]  (!%p2636_p6), %s577_s4, 16, %s579_s19, [#allocation9]  }
  0x31   : > { %s2989_s10 = sld [smem:[#allocation48_spill]]  ;;  %s2466_s22 = smov [#allocation11]  }
  0x32   : > { %s608_s23 = sshll.u32 %s2466_s22, 4  ;;  %s2467_s21 = smov [#allocation14]   ;;  %s609_s23 = int_to_ptr.vmem [resolvable:$true] %s608_s23 }
  0x33   : > { %1779 = dma.hbm_to_vmem [thread:$0]  (!%p2636_p6), %s607_s6, 16, %s609_s23, [#allocation12]  }
  0x34   : > { %s635_s7 = sshll.u32 %s2467_s21, 4  ;;  %s2990_s12 = sld [smem:[#allocation50_spill]]  ;;  %s636_s7 = int_to_ptr.vmem [resolvable:$true] %s635_s7 }
  0x35   : > { %s2991_s15 = sld [smem:[#allocation53_spill]]  ;;  %s2468_s26 = smov [#allocation17]  }
  0x36   : > { %s658_s2 = sshll.u32 %s2468_s26, 4  ;;  %s2469_s8 = smov [#allocation20]   ;;  %s659_s2 = int_to_ptr.vmem [resolvable:$true] %s658_s2 }
  0x37   : > { %s633_s27 = sshll.u32 %s2989_s10, 4  ;;  %s688_s24 = sshll.u32 %s2469_s8, 4  ;;  %s634_s27 = int_to_ptr.hbm [resolvable:$true] %s633_s27  ;;  %s689_s24 = int_to_ptr.vmem [resolvable:$true] %s688_s24 }
  0x38   : > { %1785 = dma.hbm_to_vmem [thread:$0]  (!%p2636_p6), %s634_s27, 16, %s636_s7, [#allocation15]  }
  0x39   : > { %s2992_s17 = sld [smem:[#allocation55_spill]]  ;;  %s2470_s25 = smov [#allocation23]  }
  0x3a   : > { %s656_s1 = sshll.u32 %s2990_s12, 4  ;;  %s2993_s21 = sld [smem:[#allocation43_spill]]  ;;  %s657_s1 = int_to_ptr.hbm [resolvable:$true] %s656_s1 }
  0x3b   : > { %s686_s4 = sshll.u32 %s2991_s15, 4  ;;  %s712_s26 = sshll.u32 %s2470_s25, 4  ;;  %s687_s4 = int_to_ptr.hbm [resolvable:$true] %s686_s4  ;;  %s713_s26 = int_to_ptr.vmem [resolvable:$true] %s712_s26 }
  0x3c   : > { %1791 = dma.hbm_to_vmem [thread:$0]  (!%p2636_p6), %s657_s1, 256, %s659_s2, [#allocation18], %s2464_s18, %s2464_s18, %s2465_s14  }
  0x3d   : > { %1797 = dma.hbm_to_vmem [thread:$0]  (!%p2636_p6), %s687_s4, 16, %s689_s24, [#allocation21]  }
  0x3e   : > { %s2471_s1 = smov [#allocation10]   ;;  %s2994_s9 = sld [smem:[#allocation47_spill]] }
  0x3f   : > { %s710_s7 = sshll.u32 %s2992_s17, 4  ;;  %s593_s2 = sshll.u32 %s2471_s1, 4  ;;  %s711_s7 = int_to_ptr.hbm [resolvable:$true] %s710_s7  ;;  %s594_s2 = int_to_ptr.vmem [resolvable:$true] %s593_s2 }
  0x40   : > { %s591_s19 = sshll.u32 %s2993_s21, 4  ;;  %s2995_s11 = sld [smem:[#allocation49_spill]]  ;;  %s592_s19 = int_to_ptr.hbm [resolvable:$true] %s591_s19 }
  0x41   : > { %1803 = dma.hbm_to_vmem [thread:$0]  (!%p2636_p6), %s711_s7, 16, %s713_s26, [#allocation24]  }
  0x42   : > { %1776 = dma.hbm_to_vmem [thread:$0]  (!%p2636_p6), %s592_s19, 16, %s594_s2, [#allocation9]  }
  0x43   : > { %s2472_s23 = smov [#allocation13]   ;;  %s2473_s7 = smov [#allocation16]  }
  0x44   : > { %s621_s22 = sshll.u32 %s2994_s9, 4  ;;  %s623_s21 = sshll.u32 %s2472_s23, 4  ;;  %s622_s22 = int_to_ptr.hbm [resolvable:$true] %s621_s22  ;;  %s624_s21 = int_to_ptr.vmem [resolvable:$true] %s623_s21 }
  0x45   : > { %1782 = dma.hbm_to_vmem [thread:$0]  (!%p2636_p6), %s622_s22, 16, %s624_s21, [#allocation12]  }
  0x46   : > { %s645_s27 = sshll.u32 %s2995_s11, 4  ;;  %s647_s25 = sshll.u32 %s2473_s7, 4  ;;  %s646_s27 = int_to_ptr.hbm [resolvable:$true] %s645_s27  ;;  %s648_s25 = int_to_ptr.vmem [resolvable:$true] %s647_s25 }
  0x47   : > { %s2996_s13 = sld [smem:[#allocation51_spill]]  ;;  %s2474_s4 = smov [#allocation19]  }
  0x48   : > { %1788 = dma.hbm_to_vmem [thread:$0]  (!%p2636_p6), %s646_s27, 16, %s648_s25, [#allocation15]  }
  0x49   : > { %s2997_s16 = sld [smem:[#allocation54_spill]]  ;;  %s673_s22 = sshll.u32 %s2474_s4, 4  ;;  %s674_s22 = int_to_ptr.vmem [resolvable:$true] %s673_s22 }
  0x4a   : > { %s2475_s24 = smov [#allocation22]   ;;  %s727_s7 = sshll.u32 %s2949_s20, 4  ;;  %s728_s7 = int_to_ptr.hbm [resolvable:$true] %s727_s7 }
  0x4b   : > { %s700_s27 = sshll.u32 %s2475_s24, 4  ;;  %s2476_s25 = smov [#allocation25]   ;;  %s701_s27 = int_to_ptr.vmem [resolvable:$true] %s700_s27 }
  0x4c   : > { %s729_s26 = sshll.u32 %s2476_s25, 4  ;;  %s1579_s1 = sadd.s32 4294967294, %s2460_s30   ;;  %s730_s26 = int_to_ptr.vmem [resolvable:$true] %s729_s26 }
  0x4d   : > { %s671_s8 = sshll.u32 %s2996_s13, 4  ;;  %s54_s19 = sadd.s32 1, %s2456_s29  ;;  %s672_s8 = int_to_ptr.hbm [resolvable:$true] %s671_s8 }
  0x4e   : > { %1794 = dma.hbm_to_vmem [thread:$0]  (!%p2636_p6), %s672_s8, 16, %s674_s22, [#allocation18]  }
  0x4f   : > { %s698_s6 = sshll.u32 %s2997_s16, 4  ;;  %s2710_s8 = sadd.s32 1, %s2460_s30   ;;  %s699_s6 = int_to_ptr.hbm [resolvable:$true] %s698_s6 }
  0x50   : > { %1800 = dma.hbm_to_vmem [thread:$0]  (!%p2636_p6), %s699_s6, 16, %s701_s27, [#allocation21]  }
  0x51   : > { %1806 = dma.hbm_to_vmem [thread:$0]  (!%p2636_p6), %s728_s7, 256, %s730_s26, [#allocation24], %s2464_s18, %s2464_s18, %s2465_s14  }
  0x52   : > { %s51_s2 = ssub.s32 %s2460_s30, %s2710_s8  ;;  %p61_p7 = scmp.ne.s32.totalorder %s2456_s29, %s2452_s28 }
  0x53   : > { %p52_p8 = scmp.eq.s32.totalorder %s51_s2, 0  ;;  %p62_p9 = scmp.eq.s32.totalorder %s2460_s30, 0 }
  0x54   : > { %p67_p10 = scmp.ne.s32.totalorder %s2452_s28, %s2448_s3  ;;  %p537_p11 = scmp.eq.s32.totalorder %s2619_s5, 1 }
  0x55   : > { %s2722_s6 = scalar_select %p52_p8, %s2456_s29, %s54_s19  }
  0x56   : > { %p2724_p12 = por %p62_p9, %p61_p7  ;;  %p2730_p13 = por %p68_p1, %p67_p10 }
  0x57   : > { %p2734_p0 = por %p537_p11, %p61_p7  ;;  %p543_p2 = scmp.eq.s32.totalorder %s1579_s1, 1 }
  0x58   : > { %p1831_p4 = scmp.lt.s32.totalorder %s2460_s30, 2  ;;  %s2740_s4 = sand.u32 1, %s2456_s29  }
  0x59   : > { %p2742_p6 = por %p543_p2, %p67_p10  ;;  %s1595_s24 = sshll.u32 %s2740_s4, 2 }
  0x5a   : > { %s1596_s27 = sshll.u32 %s2460_s30, 2  ;;  %s3002_s7 = sld [smem:[#allocation38_spill]] }
  0x5b   : > { %s750_s19 = scalar_lea.vmem [#allocation2], %s1595_s24  ;;  %p2753_p7 = pnand %p1831_p4, %p2724_p12 }
  0x5c   : > { %s758_s2 = sshll.u32 %s750_s19, 4  ;;  %s765_s9 = sand.u32 1, %s2460_s30   ;;  %s759_s2 = int_to_ptr.vmem [resolvable:$true] %s758_s2 }
  0x5d   : > { %s3004_s12 = sld [smem:[#allocation39_spill]]  ;;  %s747_s15 = scalar_lea.sflag [#allocation3], %s2740_s4 }
  0x5e   : > { %p2306_p9 = pneg %p2753_p7 }
  0x60   : > { %s754_s25 = scalar_lea.hbm %s3002_s7, %s1596_s27  ;;  %s2309_s21 = scalar_lea.hbm %s3002_s7, 8 }
  0x61   : > { %s756_s26 = sshll.u32 %s754_s25, 4  ;;  %s757_s26 = int_to_ptr.hbm [resolvable:$true] %s756_s26 }
  0x62   : > { %s2302_s23 = sshra.s32 %s757_s26, 4  ;;  %s2303_s23 = int_to_ptr.hbm [resolvable:$true] %s2302_s23 }
  0x63   : > { %s771_s13 = scalar_lea.hbm %s3004_s12, %s2460_s30  ;;  %s2304_s27 = scalar_lea.hbm %s2303_s23, 4 }
  0x64   : > { %p2305_p8 = scmp.ne.s32.totalorder %s2303_s23, %s2304_s27  ;;  %p2310_p12 = scmp.lt.s32.totalorder %s2303_s23, %s3002_s7 }
  0x65   : > { %p2311_p2 = scmp.lt.s32.totalorder %s2309_s21, %s2304_s27 }
  0x66   : > { %p2307_p10 = pnand %p2306_p9, %p2305_p8 }
  0x67   : > { %p2312_p4 = por %p2311_p2, %p2310_p12 }
  0x68   : > { %p2308_p11 = pneg %p2307_p10 }
  0x6a   : > { %p2313_p5 = pnand %p2312_p4, %p2308_p11 }
  0x6c   : > { %2316 = shalt.err (!%p2313_p5)
}
  0x6d   : > { %1810 = dma.hbm_to_vmem [thread:$0]  (!%p2753_p7), %s757_s26, 64, %s759_s2, %s747_s15  }
  0x6e   : > { %s773_s10 = sshll.u32 %s771_s13, 4  ;;  %s768_s11 = scalar_lea.vmem [#allocation5], %s2740_s4  ;;  %s774_s10 = int_to_ptr.hbm [resolvable:$true] %s773_s10 }
  0x6f   : > { %s775_s16 = sshll.u32 %s768_s11, 4  ;;  %s766_s0 = scalar_lea.sflag [#allocation6], %s765_s9  ;;  %s776_s16 = int_to_ptr.vmem [resolvable:$true] %s775_s16 }
  0x70   : > { %s2332_s24 = sshra.s32 %s774_s10, 4  ;;  %s2339_s21 = scalar_lea.hbm %s3004_s12, 2  ;;  %s2333_s24 = int_to_ptr.hbm [resolvable:$true] %s2332_s24 }
  0x71   : > { %s2334_s17 = scalar_lea.hbm %s2333_s24, 1  ;;  %p2340_p5 = scmp.lt.s32.totalorder %s2333_s24, %s3004_s12 }
  0x72   : > { %p2335_p8 = scmp.ne.s32.totalorder %s2333_s24, %s2334_s17  ;;  %p2341_p12 = scmp.lt.s32.totalorder %s2339_s21, %s2334_s17 }
  0x74   : > { %p2337_p10 = pnand %p2335_p8, %p2306_p9  ;;  %p2342_p2 = por %p2341_p12, %p2340_p5 }
  0x76   : > { %p2338_p11 = pneg %p2337_p10 }
  0x78   : > { %p2343_p4 = pnand %p2342_p2, %p2338_p11 }
  0x7a   : > { %2346 = shalt.err (!%p2343_p4)
}
  0x7b   : > { %1813 = dma.hbm_to_vmem [thread:$0]  (!%p2753_p7), %s774_s10, 16, %s776_s16, %s766_s0  }
  0x7c   : > { %784 = sbr.rel (%p2624_p3) target bundleno = 2168 (0x878), region = 108  ;;  %s2791_s13 = sand.u32 (!%p2624_p3), 1, %s2452_s28  }
  0x7d   : > { %s1598_s4 = sshll.u32 (!%p2624_p3), %s2791_s13, 2  ;;  %s787_s26 = scalar_lea.sflag (!%p2624_p3), [#allocation3], %s2791_s13 }
  0x7e   : > { %s790_s2 = scalar_lea.vmem (!%p2624_p3), [#allocation2], %s1598_s4 }
  0x81   : > { %2407 = dma.done.wait (%p2730_p13), %s787_s26, 64  }
  0x82   : > { %2409 = vsyncadd (%p2730_p13), %s787_s26, 4294967232  ;;  %s796_s16 = sand.u32 1, %s2619_s5   ;;  %s799_s1 = scalar_lea.vmem [#allocation5], %s2791_s13 }
  0x83   : > { %s797_s17 = scalar_lea.sflag [#allocation6], %s796_s16 }
  0x84   : > { %2411 = dma.done.wait (%p2730_p13), %s797_s17, 16  }
  0x85   : > { %2413 = vsyncadd (%p2730_p13), %s797_s17, 4294967280 }
  0x86   : > { %2415 = dma.done.wait (%p68_p1), [#allocation6], 128  }
  0x87   : > { %2417 = vsyncadd (%p68_p1), [#allocation6], 4294967168 }
  0x88   : > { %2419 = dma.done.wait (%p68_p1), [#allocation9], 32  }
  0x89   : > { %2421 = vsyncadd (%p68_p1), [#allocation9], 4294967264 }
  0x8a   : > { %2423 = dma.done.wait (%p68_p1), [#allocation12], 32  }
  0x8b   : > { %2425 = vsyncadd (%p68_p1), [#allocation12], 4294967264 }
  0x8c   : > { %2427 = dma.done.wait (%p68_p1), [#allocation15], 32  }
  0x8d   : > { %2429 = vsyncadd (%p68_p1), [#allocation15], 4294967264 }
  0x8e   : > { %2431 = dma.done.wait (%p68_p1), [#allocation18], 272  }
  0x8f   : > { %2433 = vsyncadd (%p68_p1), [#allocation18], 4294967024 }
  0x90   : > { %2435 = dma.done.wait (%p68_p1), [#allocation21], 32  }
  0x91   : > { %2437 = vsyncadd (%p68_p1), [#allocation21], 4294967264 }
  0x92   : > { %2439 = dma.done.wait (%p68_p1), [#allocation24], 272  }
  0x93   : > { %2441 = vsyncadd (%p68_p1), [#allocation24], 4294967024  ;;  %v1692_v0 = vld [vmem:[#allocation7] sm:$0xff]  ;;  %s3006_s10 = sld [smem:[#allocation44_spill]]  ;;  %v930_v3 = vld [vmem:[%s790_s2] sm:$0xf] }
  0x94   : > { %s3007_s24 = sld [smem:[#allocation42_spill]]  ;;  %954 = vmatpush.bf16.msra.mxu0 %v1692_v0  ;;  %vm943_vm0 = vcmask 130048   ;;  %v1896_v6 = vld [vmem:[#allocation8] ss:$0 sm:$0xff]  ;;  %vm981_vm1 = vcmask 261120   ;;  %s2477_s15 = smov 96  }
  0x95   : > { %v1897_v11 = vld [vmem:[#allocation11] ss:$0 sm:$0xff]  ;;  %v1002_v15 = vld [vmem:[#allocation10] sm:$0x1]  ;;  %vm1074_vm2 = vcmask 1043456   ;;  %vm1054_vm4 = vcmask 57344  }
  0x96   : > { %v1050_v24 = vld [vmem:[%s799_s1] sm:$0x1]  ;;  %v2478_v26 = vmov -1e+09   ;;  %s3008_s26 = sld [smem:[#allocation46_spill]]  ;;  %vm1070_vm5 = vcmask 64512  }
  0x97   : > { %1616 = vmatmul.msk.bf16.vlgmr.msra.gmra.mxu0 %vm943_vm0, %v930_v3  ;;  %vm1051_vm3 = vcmp.gt.f32.partialorder %v1050_v24, 0.5  ;;  %v1096_v46 = vld [vmem:[#allocation13] sm:$0x1]  ;;  %vm1125_vm6 = vcmask 253952   ;;  %v2479_v51 = vmov 32.0   ;;  %v1700_v63 = vld [vmem:[#allocation17 + $0x8] sm:$0xff] }
  0x98   : > { %v1052_v27 = vsel %vm1051_vm3, 0.0, %v2478_v26  ;;  %v1699_v0 = vld [vmem:[#allocation17] sm:$0xff]  ;;  %s3009_s14 = sld [smem:[#allocation52_spill]]  ;;  %vm1227_vm11 = vcmask 523264   ;;  %v1202_v26 = vld [vmem:[#allocation20] sm:$0x1] }
  0x99   : > { %v1694_v1 = vld [vmem:[%s3006_s10 + $0x8] sm:$0xff]  ;;  %v1693_v4 = vld [vmem:[%s3006_s10] sm:$0xff]  ;;  %s3010_s9 = sld [smem:[#allocation56_spill]] }
  0x9a   : > { %v1696_v2 = vld [vmem:[%s3007_s24 + $0x8] sm:$0xff]  ;;  %991 = vmatpush.bf16.msra.mxu1 %v1694_v1  ;;  %v1695_v5 = vld [vmem:[%s3007_s24] sm:$0xff]  ;;  %s3011_s1 = sld [smem:[#allocation57_spill]] }
  0x9b   : > { %1021 = vmatpush.bf16.msra.mxu2 %v1696_v2  ;;  %s3012_s0 = sld [smem:[#allocation58_spill]] }
  0x9c   : > { %v1698_v37 = vld [vmem:[%s3008_s26 + $0x8] sm:$0xff]  ;;  %v1697_v38 = vld [vmem:[%s3008_s26] sm:$0xff]  ;;  %s3013_s21 = sld [smem:[#allocation59_spill]] }
  0x9e   : > { %992 = vmatpush.bf16.msra.mxu1 %v1693_v4  ;;  %v1704_v1 = vld [vmem:[%s3009_s14 + $0x18] sm:$0xff]  ;;  %v1703_v4 = vld [vmem:[%s3009_s14 + $0x10] sm:$0xff] }
  0x9f   : > { %1022 = vmatpush.bf16.msra.mxu2 %v1695_v5 }
  0xa2   : > { %1118 = vmatpush.bf16.msrb.mxu1 %v1698_v37  ;;  %v1705_v37 = vld [vmem:[%s3010_s9] sm:$0xff]  ;;  %s1367_s25 = scalar_lea.hbm %s3013_s21, %s2619_s5  ;;  %s1359_s5 = scalar_lea.sflag [#allocation4], %s2791_s13 }
  0xa3   : > { %1186 = vmatpush.bf16.msrb.mxu2 %v1700_v63  ;;  %s1371_s2 = sshll.u32 %s1367_s25, 4  ;;  %s2382_s11 = scalar_lea.hbm %s3013_s21, 2  ;;  %s1372_s2 = int_to_ptr.hbm [resolvable:$true] %s1371_s2 }
  0xa4   : > { %s2376_s16 = sshra.s32 %s1372_s2, 4  ;;  %s2377_s16 = int_to_ptr.hbm [resolvable:$true] %s2376_s16 }
  0xa5   : > { %s2378_s17 = scalar_lea.hbm %s2377_s16, 1  ;;  %p2383_p7 = scmp.lt.s32.totalorder %s2377_s16, %s3013_s21 }
  0xa6   : > { %1119 = vmatpush.bf16.msrb.mxu1 %v1697_v38  ;;  %v1708_v38 = vld [vmem:[#allocation25 + $0x8] sm:$0xff]  ;;  %p2379_p1 = scmp.ne.s32.totalorder %s2377_s16, %s2378_s17  ;;  %p2384_p9 = scmp.lt.s32.totalorder %s2382_s11, %s2378_s17 }
  0xa7   : > { %1187 = vmatpush.bf16.msrb.mxu2 %v1699_v0 }
  0xa8   : > { %p2380_p3 = pnand %p2379_p1, %p2734_p0  ;;  %p2385_p8 = por %p2384_p9, %p2383_p7 }
  0xaa   : > { %p2381_p13 = pneg %p2380_p3 }
  0xac   : > { %p2386_p10 = pnand %p2385_p8, %p2381_p13 }
 0x114   : > { %v956_v7 = vpop.f32.mrf.mxu0 }
 0x115   : > { %v957_v8 = vadd.f32 %v1896_v6, %v956_v7  ;;  %v1702_v6 = vld [vmem:[%s3009_s14 + $0x8] sm:$0xff] }
 0x117   : > { %v960_v9 = vpack.c.bf16 %v957_v8, %v957_v8 }
 0x119   : > { %1625 = vmatmul.msk.bf16.vlgmr.msra.gmra.mxu1 %vm981_vm1, %v960_v9  ;;  %1634 = vmatmul.msk.bf16.vlgmr.msra.gmra.mxu2 %vm981_vm1, %v960_v9 }
 0x11a   : > { %1331 = vmatpush.bf16.msra.mxu1 %v1708_v38 }
 0x11c   : > { %v958_v10 = vpop.f32.mrf.mxu0 }
 0x196   : > { %v994_v12 = vpop.f32.mrf.mxu1 }
 0x197   : > { %v995_v13 = vadd.f32 %v1897_v11, %v994_v12 }
 0x199   : > { %v1029_v14 = vpack.c.bf16 %v995_v13, %v995_v13 }
 0x19b   : > { %1068 = vrot.lane.b32.xlu1 %v1029_v14, %s2477_s15  ;;  %v1034_v16 = vsel %vm981_vm1, %v1029_v14, 0  ;;  %v1155_v14 = vld [vmem:[#allocation14] sm:$0x1]  ;;  %s928_s15 = scalar_lea.vmem [#allocation26], %s2791_s13 }
 0x19c   : > { %v1024_v17 = vpop.f32.mrf.mxu2  ;;  %1043 = vmatpush.bf16.xpose.msra.mxu3 %v1034_v16  ;;  %v1157_v16 = vld [vmem:[#allocation16] sm:$0x1]  ;;  %s1369_s4 = sshll.u32 %s928_s15, 4  ;;  %s1370_s4 = int_to_ptr.vmem [resolvable:$true] %s1369_s4 }
 0x19d   : > { %v1025_v18 = vadd.f32 %v1024_v17, %v1002_v15 }
 0x19e   : > { %v996_v19 = vpop.f32.mrf.mxu1 }
 0x19f   : > { %v1028_v20 = vpack.c.bf16 %v1025_v18, %v1025_v18 }
 0x1a3   : > { %1635 = vmatmul.msk.bf16.vlgmr.msra.gmra.mxu3 %vm981_vm1, %v1028_v20  ;;  %v1701_v20 = vld [vmem:[%s3009_s14] sm:$0xff] }
 0x1a4   : > { %v1026_v21 = vpop.f32.mrf.mxu2  ;;  %1235 = vmatpush.bf16.msrb.mxu3 %v1704_v1 }
 0x1a5   : > { %v1164_v21 = vld [vmem:[#allocation19] sm:$0x1] }
 0x1a8   : > { %1236 = vmatpush.bf16.msrb.mxu3 %v1703_v4 }
 0x1ac   : > { %1237 = vmatpush.bf16.msrb.mxu3 %v1702_v6 }
 0x1b0   : > { %1238 = vmatpush.bf16.msrb.mxu3 %v1701_v20 }
 0x20d   : > { %v1069_v22 = vpop.permute.xlu1 %1068 }
 0x20e   : > { %v1076_v23 = vsel %vm1074_vm2, %v1069_v22, 0 }
 0x20f   : > { %1085 = vmatpush.bf16.msrb.mxu0 %v1076_v23 }
 0x226   : > { %v1045_v25 = vpop.f32.mrf.mxu3 }
 0x227   : > { %v1049_v28 = vmul.f32 0.17677669, %v1045_v25 }
 0x229   : > { %v1053_v29 = vadd.f32 %v1052_v27, %v1049_v28 }
 0x22b   : > { %v1055_v30 = vsel %vm1054_vm4, %v1053_v29, -inf }
 0x22c   : > { %1056 = vmax.xlane.f32.xlu0 %v1055_v30 }
 0x22e   : > { %v1047_v31 = vpop.f32.mrf.mxu3 }
 0x29f   : > { %v1057_v32 = vpop.xlane.xlu0 %1056 }
 0x2a0   : > { %v1058_v33 = vsub.f32 %v1053_v29, %v1057_v32 }
 0x2a2   : > { %v1059_v34 = vmul.f32 1.442695, %v1058_v33 }
 0x2a4   : > { %1898 = vpow2.f32 %v1059_v34 }
 0x2aa   : > { %v1899_v35 = vpop.eup %1898 }
 0x2ab   : > { %v1061_v36 = vsel %vm1054_vm4, %v1899_v35, 0.0 }
 0x2ac   : > { %1062 = vadd.xlane.f32.xlu0 %v1061_v36  ;;  %v1706_v36 = vld [vmem:[%s3010_s9 + $0x8] sm:$0xff] }
 0x2ad   : > { %1297 = vmatpush.bf16.msra.mxu0 %v1706_v36 }
 0x2b1   : > { %1298 = vmatpush.bf16.msra.mxu0 %v1705_v37 }
 0x31f   : > { %v1063_v39 = vpop.xlane.xlu0 %1062 }
 0x320   : > { %1900 = vrcp.f32 %v1063_v39 }
 0x321   : > { %1902 = vrcp.f32 %v2479_v51 }
 0x326   : > { %v1901_v40 = vpop.eup %1900 }
 0x327   : > { %v1065_v41 = vmul.f32 %v1901_v40, %v1899_v35  ;;  %v1903_v52 = vpop.eup %1902 }
 0x328   : > { %v1130_v53 = vmul.f32 32.0, %v1903_v52  ;;  %vm1134_vm7 = vweird.f32 %v1903_v52 }
 0x329   : > { %v1066_v42 = vpack.c.bf16 %v1065_v41, %v1065_v41  ;;  %v1707_v41 = vld [vmem:[#allocation25] sm:$0xff] }
 0x32a   : > { %v1131_v54 = vsub.f32 1.0, %v1130_v53  ;;  %1332 = vmatpush.bf16.msra.mxu1 %v1707_v41 }
 0x32b   : > { %1636 = vmatmul.msk.bf16.vlgmr.msrb.gmra.mxu0 %vm1070_vm5, %v1066_v42 }
 0x32c   : > { %v1132_v55 = vmul.f32 %v1903_v52, %v1131_v54 }
 0x32e   : > { %v1133_v56 = vadd.f32 %v1903_v52, %v1132_v55 }
 0x330   : > { %v2859_v57 = vsel %vm1134_vm7, %v1903_v52, %v1133_v56  ;;  %v1268_v52 = vld [vmem:[#allocation23] sm:$0x1]  ;;  %v1275_v56 = vld [vmem:[%s3011_s1] sm:$0x1] }
 0x3a8   : > { %v1087_v43 = vpop.f32.mrf.mxu0 }
 0x3a9   : > { %v1091_v44 = vpack.c.bf16 %v1087_v43, %v1087_v43 }
 0x3ab   : > { %1645 = vmatmul.msk.bf16.vlgmr.msrb.gmra.mxu1 %vm981_vm1, %v1091_v44 }
 0x3b0   : > { %v1089_v45 = vpop.f32.mrf.mxu0 }
 0x428   : > { %v1121_v47 = vpop.f32.mrf.mxu1 }
 0x429   : > { %v1122_v48 = vadd.f32 %v1121_v47, %v1096_v46 }
 0x42b   : > { %v1126_v49 = vsel %vm1125_vm6, %v1122_v48, 0.0 }
 0x42c   : > { %1127 = vadd.xlane.f32.xlu1 %v1126_v49  ;;  %v1266_v49 = vld [vmem:[#allocation22] sm:$0x1] }
 0x430   : > { %v1123_v50 = vpop.f32.mrf.mxu1 }
 0x49f   : > { %v1128_v58 = vpop.xlane.xlu1 %1127 }
 0x4a0   : > { %v1136_v59 = vmul.f32 %v2859_v57, %v1128_v58 }
 0x4a2   : > { %v1137_v60 = vsub.f32 %v1122_v48, %v1136_v59 }
 0x4a4   : > { %v1138_v61 = vmul.f32 %v1137_v60, %v1137_v60 }
 0x4a6   : > { %v1139_v62 = vsel %vm1125_vm6, %v1138_v61, 0.0  ;;  %v1309_v61 = vld [vmem:[%s3012_s0] sm:$0x1] }
 0x4a7   : > { %1140 = vadd.xlane.f32.xlu2 %v1139_v62 }
 0x51a   : > { %v1141_v2 = vpop.xlane.xlu2 %1140 }
 0x51b   : > { %v1142_v3 = vmul.f32 %v1141_v2, %v2859_v57 }
 0x51d   : > { %v1143_v5 = vadd.f32 1e-12, %v1142_v3 }
 0x51f   : > { %1904 = vrsqrt.f32 %v1143_v5  ;;  %vm1150_vm9 = vweird.f32 %v1143_v5 }
 0x525   : > { %v1905_v7 = vpop.eup %1904 }
 0x526   : > { %v1145_v8 = vmul.f32 %v1905_v7, %v1143_v5  ;;  %vm1151_vm8 = vweird.f32 %v1905_v7 }
 0x527   : > { %vm1152_vm10 = vmor %vm1150_vm9, %vm1151_vm8 }
 0x528   : > { %v1146_v9 = vmul.f32 %v1905_v7, %v1145_v8 }
 0x52a   : > { %v1147_v10 = vmul.f32 0.5, %v1146_v9 }
 0x52c   : > { %v1148_v11 = vsub.f32 1.5, %v1147_v10 }
 0x52e   : > { %v1149_v12 = vmul.f32 %v1905_v7, %v1148_v11 }
 0x530   : > { %v1153_v13 = vsel %vm1152_vm10, %v1905_v7, %v1149_v12 }
 0x531   : > { %v1154_v15 = vmul.f32 %v1153_v13, %v1137_v60 }
 0x533   : > { %v1156_v17 = vmul.f32 %v1155_v14, %v1154_v15 }
 0x535   : > { %v1158_v18 = vadd.f32 %v1157_v16, %v1156_v17 }
 0x537   : > { %v1159_v19 = vpack.c.bf16 %v1158_v18, %v1158_v18 }
 0x539   : > { %1654 = vmatmul.msk.bf16.vlgmr.msrb.gmra.mxu2 %vm981_vm1, %v1159_v19 }
 0x5bc   : > { %v1189_v22 = vpop.f32.mrf.mxu2 }
 0x5bd   : > { %v1190_v23 = vadd.f32 %v1189_v22, %v1164_v21 }
 0x5bf   : > { %v1193_v24 = vpack.c.bf16 %v1190_v23, %v1190_v23 }
 0x5c1   : > { %1671 = vmatmul.msk.bf16.vlgmr.msrb.gmra.mxu3 %vm1227_vm11, %v1193_v24 }
 0x5c4   : > { %v1191_v25 = vpop.f32.mrf.mxu2 }
 0x644   : > { %v1240_v27 = vpop.f32.mrf.mxu3 }
 0x645   : > { %v1241_v28 = vadd.f32 %v1240_v27, %v1202_v26 }
 0x647   : > { %v1244_v29 = vsel %vm1125_vm6, %v1241_v28, 0.0 }
 0x648   : > { %1245 = vadd.xlane.f32.xlu2 %v1244_v29 }
 0x64c   : > { %v1242_v30 = vpop.f32.mrf.mxu3 }
 0x6bb   : > { %v1246_v31 = vpop.xlane.xlu2 %1245 }
 0x6bc   : > { %v1247_v32 = vmul.f32 %v1246_v31, %v2859_v57 }
 0x6be   : > { %v1248_v33 = vsub.f32 %v1241_v28, %v1247_v32 }
 0x6c0   : > { %v1249_v34 = vmul.f32 %v1248_v33, %v1248_v33 }
 0x6c2   : > { %v1250_v35 = vsel %vm1125_vm6, %v1249_v34, 0.0 }
 0x6c3   : > { %1251 = vadd.xlane.f32.xlu0 %v1250_v35 }
 0x736   : > { %v1252_v39 = vpop.xlane.xlu0 %1251 }
 0x737   : > { %v1253_v40 = vmul.f32 %v1252_v39, %v2859_v57 }
 0x739   : > { %v1254_v42 = vadd.f32 1e-12, %v1253_v40 }
 0x73b   : > { %1906 = vrsqrt.f32 %v1254_v42  ;;  %vm1261_vm13 = vweird.f32 %v1254_v42 }
 0x741   : > { %v1907_v43 = vpop.eup %1906 }
 0x742   : > { %v1256_v44 = vmul.f32 %v1907_v43, %v1254_v42  ;;  %vm1262_vm12 = vweird.f32 %v1907_v43 }
 0x743   : > { %vm1263_vm14 = vmor %vm1261_vm13, %vm1262_vm12 }
 0x744   : > { %v1257_v45 = vmul.f32 %v1907_v43, %v1256_v44 }
 0x746   : > { %v1258_v46 = vmul.f32 0.5, %v1257_v45 }
 0x748   : > { %v1259_v47 = vsub.f32 1.5, %v1258_v46 }
 0x74a   : > { %v1260_v48 = vmul.f32 %v1907_v43, %v1259_v47 }
 0x74c   : > { %v1264_v50 = vsel %vm1263_vm14, %v1907_v43, %v1260_v48 }
 0x74d   : > { %v1265_v51 = vmul.f32 %v1264_v50, %v1248_v33 }
 0x74f   : > { %v1267_v53 = vmul.f32 %v1266_v49, %v1265_v51 }
 0x751   : > { %v1269_v54 = vadd.f32 %v1268_v52, %v1267_v53 }
 0x753   : > { %v1270_v55 = vpack.c.bf16 %v1269_v54, %v1269_v54 }
 0x755   : > { %1680 = vmatmul.msk.bf16.vlgmr.msra.gmra.mxu0 %vm981_vm1, %v1270_v55 }
 0x7d2   : > { %v1300_v57 = vpop.f32.mrf.mxu0 }
 0x7d3   : > { %v1301_v58 = vadd.f32 %v1300_v57, %v1275_v56 }
 0x7d5   : > { %v1304_v59 = vpack.c.bf16 %v1301_v58, %v1301_v58 }
 0x7d7   : > { %1689 = vmatmul.msk.bf16.vlgmr.msra.gmra.mxu1 %vm981_vm1, %v1304_v59 }
 0x7da   : > { %v1302_v60 = vpop.f32.mrf.mxu0 }
 0x854   : > { %v1334_v62 = vpop.f32.mrf.mxu1 }
 0x855   : > { %v1335_v63 = vadd.f32 %v1334_v62, %v1309_v61 }
 0x857   : > { %v1338_v0 = vsub.f32 0.0, %v1335_v63 }
 0x859   : > { %v1339_v1 = vmul.f32 1.442695, %v1338_v0 }
 0x85b   : > { %1908 = vpow2.f32 %v1339_v1 }
 0x85c   : > { %v1336_v2 = vpop.f32.mrf.mxu1 }
 0x861   : > { %v1909_v3 = vpop.eup %1908 }
 0x862   : > { %v1341_v4 = vadd.f32 1.0, %v1909_v3 }
 0x864   : > { %1910 = vrcp.f32 %v1341_v4  ;;  %v1353_v8 = vand.u32 2147483648, %v1341_v4  ;;  %v1351_v10 = vand.u32 2147483647, %v1341_v4  ;;  %vm1347_vm0 = vweird.f32 %v1341_v4 }
 0x866   : > { %v1354_v12 = vor.u32 1.1754944e-38, %v1353_v8  ;;  %vm1352_vm2 = vcmp.eq.f32.partialorder %v1351_v10, 8.507059e+37 }
 0x86a   : > { %v1911_v5 = vpop.eup %1910 }
 0x86b   : > { %v1343_v6 = vmul.f32 %v1911_v5, %v1341_v4  ;;  %vm1348_vm15 = vweird.f32 %v1911_v5 }
 0x86c   : > { %vm1349_vm1 = vmor %vm1347_vm0, %vm1348_vm15 }
 0x86d   : > { %v1344_v7 = vsub.f32 1.0, %v1343_v6 }
 0x86f   : > { %v1345_v9 = vmul.f32 %v1911_v5, %v1344_v7 }
 0x871   : > { %v1346_v11 = vadd.f32 %v1911_v5, %v1345_v9 }
 0x873   : > { %v1350_v13 = vsel %vm1349_vm1, %v1911_v5, %v1346_v11 }
 0x874   : > { %v1355_v14 = vsel %vm1352_vm2, %v1354_v12, %v1350_v13 }
 0x875   : > { %1357 = vst [vmem:[%s928_s15] sm:$0x1] %v1355_v14 }
 0x876   : > { %2389 = shalt.err (!%p2386_p10)
}
 0x877   : > { %1765 = dma.vmem_to_hbm [thread:$0]  (%p2734_p0), %s1370_s4, 16, %s1372_s2, %s1359_s5  }
 0x878 PF: > { %s1383_s13 = sand.u32 1, %s2448_s3   ;;  %p3014_p11 = scmp.ge.s32.totalorder %s2460_s30, 2 }
 0x879   : > { %s1384_s27 = scalar_lea.sflag [#allocation4], %s1383_s13 }
 0x87a   : > { %p1815_p5 = pnand %p3014_p11, %p2742_p6 }
 0x87c   : > { %p1816_p12 = pneg %p1815_p5 }
 0x87e   : > { %2443 = dma.done.wait (%p1816_p12), %s1384_s27, 16  }
 0x87f   : > { %2445 = vsyncadd (%p1816_p12), %s1384_s27, 4294967280  ;;  %p44_p2 = scmp.ge.s32.totalorder %s2710_s8, 4   ;;  %s3015_s3 = smov %s2452_s28 }
 0x880   : > { %s3016_s28 = smov %s2456_s29  ;;  %s3017_s29 = smov %s2722_s6 }
 0x881   : > { %s3018_s30 = smov %s2710_s8  ;;  %46 = sbr.rel (!%p44_p2) target bundleno = 36 (0x24), region = 218 }
 0x886   :  { %1389 = vsyncpa [#allocation3], 1 }
 0x887   :  { %1391 = vsyncpa [#allocation3 + $0x1], 1 }
 0x888   :  { %1392 = vsyncpa [#allocation6], 1 }
 0x889   :  { %1394 = vsyncpa [#allocation6 + $0x1], 1 }
 0x88a   :  { %1395 = vsyncpa [#allocation9], 1 }
 0x88b   :  { %1396 = vsyncpa [#allocation12], 1 }
 0x88c   :  { %1397 = vsyncpa [#allocation15], 1 }
 0x88d   :  { %1398 = vsyncpa [#allocation18], 1 }
 0x88e   :  { %1399 = vsyncpa [#allocation21], 1 }
 0x88f   :  { %1400 = vsyncpa [#allocation24], 1 }
 0x890   :  { %1401 = vsyncpa [#allocation4], 1 }
 0x891   :  { %1403 = vsyncpa [#allocation4 + $0x1], 1 }

</bundles_post_ra>
